<compile_context>
chip_gen: v7x
topology: tpu7x:2x2x1
jax: 0.10.0
libtpu: 0.0.40
codegen_flags: <defaults>
</compile_context>

<pallas_src>
import functools

import jax
import jax.numpy as jnp
from jax import lax
from jax.experimental import pallas as pl
from jax.experimental.pallas import tpu as pltpu


# -----------------------------------------------------------------------------
# Fused kernel: per grid step (TB batch elements)
#   y block (D, TB*L)  --fused 1st-layer matmul-->  hidden (4C+2Dh, TB*L)
#   block-diag 2nd layer (incl. words heads) --> [g0|b0|g1|b1|logit0|logit1] (4C+2, TB*L)
#   per-batch masked softmax over words + attention-weighted reduce -> (C,1) scales
#   h = leaky( g1 * leaky( g0 * x + b0 ) + b1 )  on the lane-dense (TB*C, S) x block
# -----------------------------------------------------------------------------
def _fused_dfblk_kernel(mask_ref,                      # SMEM (B,) int32 (scalar prefetch)
                        y_ref,                         # (D, TB*L)   words on lanes
                        x_ref,                         # (TB*C, S)   spatial on lanes
                        w1t_ref, b1c_ref,              # (4C+2Dh, D), (4C+2Dh, 1)
                        w2_ref, b2_ref,                # (4C+2, 4C+2Dh), (4C+2, 1)
                        h_ref,                         # (TB*C, S)
                        attn_ref,                      # (TB*2, L)
                        *, C, L, TB):
    i = pl.program_id(0)

    # Fused first layers (gamma/beta/words MLPs of BOTH affine stages): one MXU push.
    h_all = jnp.maximum(
        jnp.dot(w1t_ref[...], y_ref[...], preferred_element_type=jnp.float32)
        + b1c_ref[...], 0.0)                                   # (4C+2Dh, TB*L)

    # Fused block-diagonal second layers (gamma0|beta0|gamma1|beta1|logit0|logit1).
    out2 = (jnp.dot(w2_ref[...], h_all, preferred_element_type=jnp.float32)
            + b2_ref[...])                                     # (4C+2, TB*L)

    l_iota = lax.broadcasted_iota(jnp.int32, (1, L), 1)

    g0s, b0s, g1s, b1s, attns = [], [], [], [], []
    for tb in range(TB):                                       # static unroll, tiny data
        col = out2[:, tb * L:(tb + 1) * L]                     # (4C+2, L)
        n_valid = mask_ref[i * TB + tb]
        valid = l_iota < n_valid                               # (1, L)

        # Softmax over words.  sigmoid output is in (0,1) so no max-subtraction is
        # needed; masked words contribute exactly 0 (== exp(-inf) in the reference).
        e0 = jnp.where(valid, jnp.exp(jax.nn.sigmoid(col[4 * C:4 * C + 1, :])), 0.0)
        e1 = jnp.where(valid, jnp.exp(jax.nn.sigmoid(col[4 * C + 1:4 * C + 2, :])), 0.0)
        a0 = e0 * pl.reciprocal(jnp.sum(e0, axis=1, keepdims=True), approx=True)
        a1 = e1 * pl.reciprocal(jnp.sum(e1, axis=1, keepdims=True), approx=True)

        # Attention-weighted reduce over words -> effective per-channel scale/shift.
        eff0 = jnp.sum(col[0:2 * C, :] * a0, axis=1, keepdims=True)       # [g0|beta0] (2C,1)
        eff1 = jnp.sum(col[2 * C:4 * C, :] * a1, axis=1, keepdims=True)   # [g1|beta1] (2C,1)

        g0s.append(eff0[0:C]); b0s.append(eff0[C:2 * C])
        g1s.append(eff1[0:C]); b1s.append(eff1[C:2 * C])
        attns.append(a0); attns.append(a1)

    def _cat(parts):
        return parts[0] if len(parts) == 1 else jnp.concatenate(parts, axis=0)

    g0 = _cat(g0s); b0 = _cat(b0s)                              # (TB*C, 1)
    g1 = _cat(g1s); b1 = _cat(b1s)
    attn_ref[...] = _cat(attns)                                 # (TB*2, L)

    # Two affine stages + LeakyReLU(0.2) on the lane-dense (TB*C, S) block.
    x2 = x_ref[...]
    t = g0 * x2 + b0
    t = jnp.maximum(t, 0.2 * t)
    t = g1 * t + b1
    t = jnp.maximum(t, 0.2 * t)
    h_ref[...] = t


# -----------------------------------------------------------------------------
# Parameter packing (wrapper side, tiny tensors): pre-transposed / fused layouts.
# -----------------------------------------------------------------------------
def _pack_params(p0, p1):
    (wg1_0, bg1_0, wg2_0, bg2_0, wb1_0, bb1_0, wb2_0, bb2_0, ww1_0, bw1_0, ww2_0, bw2_0) = p0
    (wg1_1, bg1_1, wg2_1, bg2_1, wb1_1, bb1_1, wb2_1, bb2_1, ww1_1, bw1_1, ww2_1, bw2_1) = p1

    # Fused first layers, pre-transposed: rows = [g0 | b0 | g1 | b1 | w0 | w1] hidden units.
    w1t = jnp.concatenate([wg1_0.T, wb1_0.T, wg1_1.T, wb1_1.T, ww1_0.T, ww1_1.T], axis=0)
    b1c = jnp.concatenate([bg1_0.T, bb1_0.T, bg1_1.T, bb1_1.T, bw1_0.T, bw1_1.T], axis=0)

    # Fused (block-diagonal) second layers, INCLUDING the two words-weight heads as the
    # last two rows: output rows = [gamma0 | beta0 | gamma1 | beta1 | logit0 | logit1].
    w2t = jax.scipy.linalg.block_diag(wg2_0.T, wb2_0.T, wg2_1.T, wb2_1.T, ww2_0.T, ww2_1.T)
    b2c = jnp.concatenate([bg2_0.T, bb2_0.T, bg2_1.T, bb2_1.T, bw2_0.T, bw2_1.T], axis=0)
    return w1t, b1c, w2t, b2c


def _pick_tb(batch):
    """Batches per grid step: fill sublanes / amortize step overhead, but keep >=2
    grid steps when batch is large enough so v7x's 2 TensorCores both get work."""
    cap = 8
    divisors = [d for d in range(1, min(batch, cap) + 1) if batch % d == 0]
    tb = divisors[-1]
    if batch > 4:
        for d in reversed(divisors):
            if batch // d >= 2:
                tb = d
                break
    return tb


# -----------------------------------------------------------------------------
# Public wrapper: local_DFBLK.forward
# -----------------------------------------------------------------------------
def local_dfblk_pallas(x, y, mask, params0, params1, batch_block=None):
    """x: (B, C, H, W) f32 (NCHW), y: (B, cond_dim, L) f32, mask: (B,) int32."""
    B, C, H, W = x.shape
    D, L = y.shape[1], y.shape[2]
    S = H * W
    TB = batch_block if batch_block is not None else _pick_tb(B)
    assert B % TB == 0, "batch must be divisible by the batch block"

    x_flat = x.reshape(B * C, S).astype(jnp.float32)       # free reshape, lane-dense rows
    # Words on lanes, batch-major columns: (D, B*L).  Tiny wrapper-side transpose.
    y_t = jnp.transpose(y.astype(jnp.float32), (1, 0, 2)).reshape(D, B * L)

    w1t, b1c, w2t, b2c = _pack_params(params0, params1)

    kernel = functools.partial(_fused_dfblk_kernel, C=C, L=L, TB=TB)

    in_specs = [
        pl.BlockSpec((D, TB * L), lambda i, m: (0, i)),
        pl.BlockSpec((TB * C, S), lambda i, m: (i, 0)),
        pl.BlockSpec(w1t.shape, lambda i, m: (0, 0)),
        pl.BlockSpec(b1c.shape, lambda i, m: (0, 0)),
        pl.BlockSpec(w2t.shape, lambda i, m: (0, 0)),
        pl.BlockSpec(b2c.shape, lambda i, m: (0, 0)),
    ]
    out_shape = (jax.ShapeDtypeStruct((B * C, S), jnp.float32),
                 jax.ShapeDtypeStruct((B * 2, L), jnp.float32))
    out_specs = [pl.BlockSpec((TB * C, S), lambda i, m: (i, 0)),
                 pl.BlockSpec((TB * 2, L), lambda i, m: (i, 0))]

    h_flat, attn = pl.pallas_call(
        kernel,
        out_shape=out_shape,
        grid_spec=pltpu.PrefetchScalarGridSpec(
            num_scalar_prefetch=1,
            grid=(B // TB,),
            in_specs=in_specs,
            out_specs=out_specs),
        compiler_params=pltpu.CompilerParams(
            dimension_semantics=("parallel",)),             # disjoint per-step outputs
    )(mask.astype(jnp.int32), y_t, x_flat, w1t, b1c, w2t, b2c)

    h = h_flat.reshape(B, C, H, W)
    # Module contract: each re_weight has shape (B, L, 1).
    attn = attn.reshape(B, 2, L)
    attn0 = attn[:, 0, :, None]
    attn1 = attn[:, 1, :, None]
    return h, [attn0, attn1]


# -----------------------------------------------------------------------------
# Deterministic parameter init (shapes follow Affine_word.__init__).
# PyTorch Linear(d_in, d_out) -> stored transposed as (d_in, d_out), bias (1, d_out).
# -----------------------------------------------------------------------------
def _init_linear(key, din, dout):
    kw, kb = jax.random.split(key)
    bound = 1.0 / (din ** 0.5)
    w = jax.random.uniform(kw, (din, dout), jnp.float32, -bound, bound)
    b = jax.random.uniform(kb, (1, dout), jnp.float32, -bound, bound)
    return w, b


def init_affine_word(key, cond_dim, num_features):
    D, C, Dh = cond_dim, num_features, cond_dim // 2
    ks = jax.random.split(key, 6)
    wg1, bg1 = _init_linear(ks[0], D, C)
    wg2, bg2 = _init_linear(ks[1], C, C)
    wb1, bb1 = _init_linear(ks[2], D, C)
    wb2, bb2 = _init_linear(ks[3], C, C)
    ww1, bw1 = _init_linear(ks[4], D, Dh)
    ww2, bw2 = _init_linear(ks[5], Dh, 1)
    return (wg1, bg1, wg2, bg2, wb1, bb1, wb2, bb2, ww1, bw1, ww2, bw2)


# -----------------------------------------------------------------------------
# Pure-JAX reference (mirrors the PyTorch forward) for correctness checking.
# -----------------------------------------------------------------------------
def _affine_word_ref(x, cond, mask, p):
    (wg1, bg1, wg2, bg2, wb1, bb1, wb2, bb2, ww1, bw1, ww2, bw2) = p
    gamma = jnp.maximum(cond @ wg1 + bg1, 0.0) @ wg2 + bg2                  # (B, L, C)
    beta = jnp.maximum(cond @ wb1 + bb1, 0.0) @ wb2 + bb2                   # (B, L, C)
    logit = jax.nn.sigmoid(jnp.maximum(cond @ ww1 + bw1, 0.0) @ ww2 + bw2)  # (B, L, 1)
    L = cond.shape[1]
    l_idx = jnp.arange(L)[None, :, None]
    logit = jnp.where(l_idx < mask[:, None, None], logit, -jnp.inf)
    attn = jax.nn.softmax(logit, axis=1)
    g = jnp.sum(attn * gamma, axis=1)                                       # (B, C)
    bb_ = jnp.sum(attn * beta, axis=1)                                      # (B, C)
    out = g[:, :, None, None] * x + bb_[:, :, None, None]
    return out, attn


def local_dfblk_ref(x, y, mask, p0, p1):
    cond = jnp.transpose(y, (0, 2, 1))
    h, a0 = _affine_word_ref(x, cond, mask, p0)
    h = jnp.where(h >= 0.0, h, 0.2 * h)
    h, a1 = _affine_word_ref(h, cond, mask, p1)
    h = jnp.where(h >= 0.0, h, 0.2 * h)
    return h, [a0, a1]


if __name__ == "__main__":
    B, in_ch, H, W = 2, 4, 16, 16          # x: NCHW
    cond_dim, L = 32, 8                    # y: (B, cond_dim, L) word features

    key = jax.random.PRNGKey(0)
    kx, ky, kp0, kp1 = jax.random.split(key, 4)

    x = jax.random.normal(kx, (B, in_ch, H, W), dtype=jnp.float32)
    y = jax.random.normal(ky, (B, cond_dim, L), dtype=jnp.float32)
    mask = jnp.array([5, 8], dtype=jnp.int32)      # valid word counts per batch

    params0 = init_affine_word(kp0, cond_dim, in_ch)
    params1 = init_affine_word(kp1, cond_dim, in_ch)

    h, (w0, w1) = local_dfblk_pallas(x, y, mask, params0, params1)
    jax.block_until_ready(h)
    jax.block_until_ready(w0)
    jax.block_until_ready(w1)

    h_ref, (w0_ref, w1_ref) = local_dfblk_ref(x, y, mask, params0, params1)

    assert h.shape == (B, in_ch, H, W)
    assert w0.shape == (B, L, 1) and w1.shape == (B, L, 1)
    assert jnp.allclose(h, h_ref, rtol=1e-3, atol=1e-3), "output mismatch"
    assert jnp.allclose(w0, w0_ref, rtol=1e-3, atol=1e-3), "attn0 mismatch"
    assert jnp.allclose(w1, w1_ref, rtol=1e-3, atol=1e-3), "attn1 mismatch"

    print("KERNEL_OK")
</pallas_src>

<mosaic_0001>
module attributes {stable_mosaic.version = 11 : i64} {
  func.func @_fused_dfblk_kernel(%arg0: i32, %arg1: memref<2xi32, #tpu.memory_space<smem>>, %arg2: memref<32x16xf32, #tpu.memory_space<vmem>>, %arg3: memref<8x256xf32, #tpu.memory_space<vmem>>, %arg4: memref<48x32xf32, #tpu.memory_space<vmem>>, %arg5: memref<48x1xf32, #tpu.memory_space<vmem>>, %arg6: memref<18x48xf32, #tpu.memory_space<vmem>>, %arg7: memref<18x1xf32, #tpu.memory_space<vmem>>, %arg8: memref<8x256xf32, #tpu.memory_space<vmem>>, %arg9: memref<4x8xf32, #tpu.memory_space<vmem>>) attributes {dimension_semantics = [#tpu.dimension_semantics<parallel>], iteration_bounds = array<i64: 1>, scalar_prefetch = 1 : i64, scratch_operands = 0 : i64, tpu.core_type = #tpu.core_type<tc>, window_params = [{transform_indices = @transform_0, window_bounds = array<i64: 32, 16>}, {transform_indices = @transform_1, window_bounds = array<i64: 8, 256>}, {pipeline_mode = #tpu.pipeline_mode<synchronous>, transform_indices = @transform_2, window_bounds = array<i64: 48, 32>}, {pipeline_mode = #tpu.pipeline_mode<synchronous>, transform_indices = @transform_3, window_bounds = array<i64: 48, 1>}, {pipeline_mode = #tpu.pipeline_mode<synchronous>, transform_indices = @transform_4, window_bounds = array<i64: 18, 48>}, {pipeline_mode = #tpu.pipeline_mode<synchronous>, transform_indices = @transform_5, window_bounds = array<i64: 18, 1>}, {transform_indices = @transform_6, window_bounds = array<i64: 8, 256>}, {transform_indices = @transform_7, window_bounds = array<i64: 4, 8>}]} {
    %c0 = arith.constant 0 : index
    %c0_0 = arith.constant 0 : index
    %0 = vector.load %arg4[%c0, %c0_0] : memref<48x32xf32, #tpu.memory_space<vmem>>, vector<48x32xf32>
    %c0_1 = arith.constant 0 : index
    %c0_2 = arith.constant 0 : index
    %1 = vector.load %arg2[%c0_1, %c0_2] : memref<32x16xf32, #tpu.memory_space<vmem>>, vector<32x16xf32>
    %cst = arith.constant dense<0.000000e+00> : vector<48x16xf32>
    %2 = tpu.matmul %0, %1, %cst {dimension_numbers = #tpu.dot_dimension_numbers<[1], [0], [0], [1], [0, 0, 1, 1], [], []>} : vector<48x32xf32>, vector<32x16xf32>, vector<48x16xf32> -> vector<48x16xf32>
    %c0_3 = arith.constant 0 : index
    %c0_4 = arith.constant 0 : index
    %3 = vector.load %arg5[%c0_3, %c0_4] : memref<48x1xf32, #tpu.memory_space<vmem>>, vector<48x1xf32>
    %4 = vector.broadcast %3 : vector<48x1xf32> to vector<48x16xf32>
    %5 = arith.addf %2, %4 : vector<48x16xf32>
    %cst_5 = arith.constant 0.000000e+00 : f32
    %6 = vector.broadcast %cst_5 : f32 to vector<48x16xf32>
    %7 = arith.maximumf %5, %6 : vector<48x16xf32>
    %c0_6 = arith.constant 0 : index
    %c0_7 = arith.constant 0 : index
    %8 = vector.load %arg6[%c0_6, %c0_7] : memref<18x48xf32, #tpu.memory_space<vmem>>, vector<18x48xf32>
    %cst_8 = arith.constant dense<0.000000e+00> : vector<18x16xf32>
    %9 = tpu.matmul %8, %7, %cst_8 {dimension_numbers = #tpu.dot_dimension_numbers<[1], [0], [0], [1], [0, 0, 1, 1], [], []>} : vector<18x48xf32>, vector<48x16xf32>, vector<18x16xf32> -> vector<18x16xf32>
    %c0_9 = arith.constant 0 : index
    %c0_10 = arith.constant 0 : index
    %10 = vector.load %arg7[%c0_9, %c0_10] : memref<18x1xf32, #tpu.memory_space<vmem>>, vector<18x1xf32>
    %11 = vector.broadcast %10 : vector<18x1xf32> to vector<18x16xf32>
    %12 = arith.addf %9, %11 : vector<18x16xf32>
    %13 = tpu.iota {dimensions = array<i32: 1>} : vector<1x8xi32>
    %14 = vector.extract_strided_slice %12 {offsets = [0, 0], sizes = [18, 8], strides = [1, 1]} : vector<18x16xf32> to vector<18x8xf32>
    %c2_i32 = arith.constant 2 : i32
    %15 = arith.muli %arg0, %c2_i32 : i32
    %c0_i32 = arith.constant 0 : i32
    %16 = arith.addi %15, %c0_i32 : i32
    %17 = arith.index_cast %16 : i32 to index
    %18 = memref.load %arg1[%17] : memref<2xi32, #tpu.memory_space<smem>>
    %19 = vector.broadcast %18 : i32 to vector<1x8xi32>
    %20 = arith.cmpi slt, %13, %19 : vector<1x8xi32>
    %21 = vector.extract_strided_slice %14 {offsets = [16, 0], sizes = [1, 8], strides = [1, 1]} : vector<18x8xf32> to vector<1x8xf32>
    %22 = arith.negf %21 : vector<1x8xf32>
    %23 = math.exp %22 : vector<1x8xf32>
    %cst_11 = arith.constant 1.000000e+00 : f32
    %24 = vector.broadcast %cst_11 : f32 to vector<1x8xf32>
    %25 = arith.addf %24, %23 : vector<1x8xf32>
    %26 = arith.divf %24, %25 : vector<1x8xf32>
    %27 = math.exp %26 : vector<1x8xf32>
    %cst_12 = arith.constant 0.000000e+00 : f32
    %28 = vector.broadcast %cst_12 : f32 to vector<1x8xf32>
    %29 = arith.select %20, %27, %28 : vector<1x8xi1>, vector<1x8xf32>
    %30 = vector.extract_strided_slice %14 {offsets = [17, 0], sizes = [1, 8], strides = [1, 1]} : vector<18x8xf32> to vector<1x8xf32>
    %31 = arith.negf %30 : vector<1x8xf32>
    %32 = math.exp %31 : vector<1x8xf32>
    %cst_13 = arith.constant 1.000000e+00 : f32
    %33 = vector.broadcast %cst_13 : f32 to vector<1x8xf32>
    %34 = arith.addf %33, %32 : vector<1x8xf32>
    %35 = arith.divf %33, %34 : vector<1x8xf32>
    %36 = math.exp %35 : vector<1x8xf32>
    %cst_14 = arith.constant 0.000000e+00 : f32
    %37 = vector.broadcast %cst_14 : f32 to vector<1x8xf32>
    %38 = arith.select %20, %36, %37 : vector<1x8xi1>, vector<1x8xf32>
    %cst_15 = arith.constant dense<0.000000e+00> : vector<1xf32>
    %39 = vector.multi_reduction <add>, %29, %cst_15 [1] : vector<1x8xf32> to vector<1xf32>
    %40 = vector.shape_cast %39 : vector<1xf32> to vector<1x1xf32>
    %41 = tpu.reciprocal %40 {approx = true} : vector<1x1xf32> -> vector<1x1xf32>
    %42 = vector.broadcast %41 : vector<1x1xf32> to vector<1x8xf32>
    %43 = arith.mulf %29, %42 : vector<1x8xf32>
    %cst_16 = arith.constant dense<0.000000e+00> : vector<1xf32>
    %44 = vector.multi_reduction <add>, %38, %cst_16 [1] : vector<1x8xf32> to vector<1xf32>
    %45 = vector.shape_cast %44 : vector<1xf32> to vector<1x1xf32>
    %46 = tpu.reciprocal %45 {approx = true} : vector<1x1xf32> -> vector<1x1xf32>
    %47 = vector.broadcast %46 : vector<1x1xf32> to vector<1x8xf32>
    %48 = arith.mulf %38, %47 : vector<1x8xf32>
    %49 = vector.extract_strided_slice %14 {offsets = [0, 0], sizes = [8, 8], strides = [1, 1]} : vector<18x8xf32> to vector<8x8xf32>
    %50 = vector.broadcast %43 : vector<1x8xf32> to vector<8x8xf32>
    %51 = arith.mulf %49, %50 : vector<8x8xf32>
    %cst_17 = arith.constant dense<0.000000e+00> : vector<8xf32>
    %52 = vector.multi_reduction <add>, %51, %cst_17 [1] : vector<8x8xf32> to vector<8xf32>
    %53 = vector.shape_cast %52 : vector<8xf32> to vector<8x1xf32>
    %54 = vector.extract_strided_slice %14 {offsets = [8, 0], sizes = [8, 8], strides = [1, 1]} : vector<18x8xf32> to vector<8x8xf32>
    %55 = vector.broadcast %48 : vector<1x8xf32> to vector<8x8xf32>
    %56 = arith.mulf %54, %55 : vector<8x8xf32>
    %cst_18 = arith.constant dense<0.000000e+00> : vector<8xf32>
    %57 = vector.multi_reduction <add>, %56, %cst_18 [1] : vector<8x8xf32> to vector<8xf32>
    %58 = vector.shape_cast %57 : vector<8xf32> to vector<8x1xf32>
    %59 = vector.extract_strided_slice %53 {offsets = [0, 0], sizes = [4, 1], strides = [1, 1]} : vector<8x1xf32> to vector<4x1xf32>
    %60 = vector.extract_strided_slice %53 {offsets = [4, 0], sizes = [4, 1], strides = [1, 1]} : vector<8x1xf32> to vector<4x1xf32>
    %61 = vector.extract_strided_slice %58 {offsets = [0, 0], sizes = [4, 1], strides = [1, 1]} : vector<8x1xf32> to vector<4x1xf32>
    %62 = vector.extract_strided_slice %58 {offsets = [4, 0], sizes = [4, 1], strides = [1, 1]} : vector<8x1xf32> to vector<4x1xf32>
    %63 = vector.extract_strided_slice %12 {offsets = [0, 8], sizes = [18, 8], strides = [1, 1]} : vector<18x16xf32> to vector<18x8xf32>
    %c2_i32_19 = arith.constant 2 : i32
    %64 = arith.muli %arg0, %c2_i32_19 : i32
    %c1_i32 = arith.constant 1 : i32
    %65 = arith.addi %64, %c1_i32 : i32
    %66 = arith.index_cast %65 : i32 to index
    %67 = memref.load %arg1[%66] : memref<2xi32, #tpu.memory_space<smem>>
    %68 = vector.broadcast %67 : i32 to vector<1x8xi32>
    %69 = arith.cmpi slt, %13, %68 : vector<1x8xi32>
    %70 = vector.extract_strided_slice %63 {offsets = [16, 0], sizes = [1, 8], strides = [1, 1]} : vector<18x8xf32> to vector<1x8xf32>
    %71 = arith.negf %70 : vector<1x8xf32>
    %72 = math.exp %71 : vector<1x8xf32>
    %cst_20 = arith.constant 1.000000e+00 : f32
    %73 = vector.broadcast %cst_20 : f32 to vector<1x8xf32>
    %74 = arith.addf %73, %72 : vector<1x8xf32>
    %75 = arith.divf %73, %74 : vector<1x8xf32>
    %76 = math.exp %75 : vector<1x8xf32>
    %cst_21 = arith.constant 0.000000e+00 : f32
    %77 = vector.broadcast %cst_21 : f32 to vector<1x8xf32>
    %78 = arith.select %69, %76, %77 : vector<1x8xi1>, vector<1x8xf32>
    %79 = vector.extract_strided_slice %63 {offsets = [17, 0], sizes = [1, 8], strides = [1, 1]} : vector<18x8xf32> to vector<1x8xf32>
    %80 = arith.negf %79 : vector<1x8xf32>
    %81 = math.exp %80 : vector<1x8xf32>
    %cst_22 = arith.constant 1.000000e+00 : f32
    %82 = vector.broadcast %cst_22 : f32 to vector<1x8xf32>
    %83 = arith.addf %82, %81 : vector<1x8xf32>
    %84 = arith.divf %82, %83 : vector<1x8xf32>
    %85 = math.exp %84 : vector<1x8xf32>
    %cst_23 = arith.constant 0.000000e+00 : f32
    %86 = vector.broadcast %cst_23 : f32 to vector<1x8xf32>
    %87 = arith.select %69, %85, %86 : vector<1x8xi1>, vector<1x8xf32>
    %cst_24 = arith.constant dense<0.000000e+00> : vector<1xf32>
    %88 = vector.multi_reduction <add>, %78, %cst_24 [1] : vector<1x8xf32> to vector<1xf32>
    %89 = vector.shape_cast %88 : vector<1xf32> to vector<1x1xf32>
    %90 = tpu.reciprocal %89 {approx = true} : vector<1x1xf32> -> vector<1x1xf32>
    %91 = vector.broadcast %90 : vector<1x1xf32> to vector<1x8xf32>
    %92 = arith.mulf %78, %91 : vector<1x8xf32>
    %cst_25 = arith.constant dense<0.000000e+00> : vector<1xf32>
    %93 = vector.multi_reduction <add>, %87, %cst_25 [1] : vector<1x8xf32> to vector<1xf32>
    %94 = vector.shape_cast %93 : vector<1xf32> to vector<1x1xf32>
    %95 = tpu.reciprocal %94 {approx = true} : vector<1x1xf32> -> vector<1x1xf32>
    %96 = vector.broadcast %95 : vector<1x1xf32> to vector<1x8xf32>
    %97 = arith.mulf %87, %96 : vector<1x8xf32>
    %98 = vector.extract_strided_slice %63 {offsets = [0, 0], sizes = [8, 8], strides = [1, 1]} : vector<18x8xf32> to vector<8x8xf32>
    %99 = vector.broadcast %92 : vector<1x8xf32> to vector<8x8xf32>
    %100 = arith.mulf %98, %99 : vector<8x8xf32>
    %cst_26 = arith.constant dense<0.000000e+00> : vector<8xf32>
    %101 = vector.multi_reduction <add>, %100, %cst_26 [1] : vector<8x8xf32> to vector<8xf32>
    %102 = vector.shape_cast %101 : vector<8xf32> to vector<8x1xf32>
    %103 = vector.extract_strided_slice %63 {offsets = [8, 0], sizes = [8, 8], strides = [1, 1]} : vector<18x8xf32> to vector<8x8xf32>
    %104 = vector.broadcast %97 : vector<1x8xf32> to vector<8x8xf32>
    %105 = arith.mulf %103, %104 : vector<8x8xf32>
    %cst_27 = arith.constant dense<0.000000e+00> : vector<8xf32>
    %106 = vector.multi_reduction <add>, %105, %cst_27 [1] : vector<8x8xf32> to vector<8xf32>
    %107 = vector.shape_cast %106 : vector<8xf32> to vector<8x1xf32>
    %108 = vector.extract_strided_slice %102 {offsets = [0, 0], sizes = [4, 1], strides = [1, 1]} : vector<8x1xf32> to vector<4x1xf32>
    %109 = vector.extract_strided_slice %102 {offsets = [4, 0], sizes = [4, 1], strides = [1, 1]} : vector<8x1xf32> to vector<4x1xf32>
    %110 = vector.extract_strided_slice %107 {offsets = [0, 0], sizes = [4, 1], strides = [1, 1]} : vector<8x1xf32> to vector<4x1xf32>
    %111 = vector.extract_strided_slice %107 {offsets = [4, 0], sizes = [4, 1], strides = [1, 1]} : vector<8x1xf32> to vector<4x1xf32>
    %112 = tpu.concatenate %59, %108 in 0 : vector<4x1xf32>, vector<4x1xf32> -> vector<8x1xf32>
    %113 = tpu.concatenate %60, %109 in 0 : vector<4x1xf32>, vector<4x1xf32> -> vector<8x1xf32>
    %114 = tpu.concatenate %61, %110 in 0 : vector<4x1xf32>, vector<4x1xf32> -> vector<8x1xf32>
    %115 = tpu.concatenate %62, %111 in 0 : vector<4x1xf32>, vector<4x1xf32> -> vector<8x1xf32>
    %116 = tpu.concatenate %43, %48, %92, %97 in 0 : vector<1x8xf32>, vector<1x8xf32>, vector<1x8xf32>, vector<1x8xf32> -> vector<4x8xf32>
    %c0_28 = arith.constant 0 : index
    %c0_29 = arith.constant 0 : index
    %117 = vector.load %arg9[%c0_28, %c0_29] : memref<4x8xf32, #tpu.memory_space<vmem>>, vector<4x8xf32>
    tpu.vector_store %arg9[%c0_28, %c0_29], %116 {strides = array<i32>} : memref<4x8xf32, #tpu.memory_space<vmem>>, vector<4x8xf32>,
    %c0_30 = arith.constant 0 : index
    %c0_31 = arith.constant 0 : index
    %118 = vector.load %arg3[%c0_30, %c0_31] : memref<8x256xf32, #tpu.memory_space<vmem>>, vector<8x256xf32>
    %119 = vector.broadcast %112 : vector<8x1xf32> to vector<8x256xf32>
    %120 = arith.mulf %119, %118 : vector<8x256xf32>
    %121 = vector.broadcast %113 : vector<8x1xf32> to vector<8x256xf32>
    %122 = arith.addf %120, %121 : vector<8x256xf32>
    %cst_32 = arith.constant 2.000000e-01 : f32
    %123 = vector.broadcast %cst_32 : f32 to vector<8x256xf32>
    %124 = arith.mulf %123, %122 : vector<8x256xf32>
    %125 = arith.maximumf %122, %124 : vector<8x256xf32>
    %126 = vector.broadcast %114 : vector<8x1xf32> to vector<8x256xf32>
    %127 = arith.mulf %126, %125 : vector<8x256xf32>
    %128 = vector.broadcast %115 : vector<8x1xf32> to vector<8x256xf32>
    %129 = arith.addf %127, %128 : vector<8x256xf32>
    %cst_33 = arith.constant 2.000000e-01 : f32
    %130 = vector.broadcast %cst_33 : f32 to vector<8x256xf32>
    %131 = arith.mulf %130, %129 : vector<8x256xf32>
    %132 = arith.maximumf %129, %131 : vector<8x256xf32>
    %c0_34 = arith.constant 0 : index
    %c0_35 = arith.constant 0 : index
    %133 = vector.load %arg8[%c0_34, %c0_35] : memref<8x256xf32, #tpu.memory_space<vmem>>, vector<8x256xf32>
    tpu.vector_store %arg8[%c0_34, %c0_35], %132 {strides = array<i32>} : memref<8x256xf32, #tpu.memory_space<vmem>>, vector<8x256xf32>,
    return
  }
  func.func @transform_0(%arg0: i32, %arg1: memref<2xi32, #tpu.memory_space<smem>>) -> (i32, i32) {
    %c0_i32 = arith.constant 0 : i32
    %c0_i32_0 = arith.constant 0 : i32
    return %c0_i32, %arg0 : i32, i32
  }
  func.func @transform_1(%arg0: i32, %arg1: memref<2xi32, #tpu.memory_space<smem>>) -> (i32, i32) {
    %c0_i32 = arith.constant 0 : i32
    %c0_i32_0 = arith.constant 0 : i32
    return %arg0, %c0_i32 : i32, i32
  }
  func.func @transform_2(%arg0: i32, %arg1: memref<2xi32, #tpu.memory_space<smem>>) -> (i32, i32) {
    %c0_i32 = arith.constant 0 : i32
    %c0_i32_0 = arith.constant 0 : i32
    %c0_i32_1 = arith.constant 0 : i32
    return %c0_i32, %c0_i32_0 : i32, i32
  }
  func.func @transform_3(%arg0: i32, %arg1: memref<2xi32, #tpu.memory_space<smem>>) -> (i32, i32) {
    %c0_i32 = arith.constant 0 : i32
    %c0_i32_0 = arith.constant 0 : i32
    %c0_i32_1 = arith.constant 0 : i32
    return %c0_i32, %c0_i32_0 : i32, i32
  }
  func.func @transform_4(%arg0: i32, %arg1: memref<2xi32, #tpu.memory_space<smem>>) -> (i32, i32) {
    %c0_i32 = arith.constant 0 : i32
    %c0_i32_0 = arith.constant 0 : i32
    %c0_i32_1 = arith.constant 0 : i32
    return %c0_i32, %c0_i32_0 : i32, i32
  }
  func.func @transform_5(%arg0: i32, %arg1: memref<2xi32, #tpu.memory_space<smem>>) -> (i32, i32) {
    %c0_i32 = arith.constant 0 : i32
    %c0_i32_0 = arith.constant 0 : i32
    %c0_i32_1 = arith.constant 0 : i32
    return %c0_i32, %c0_i32_0 : i32, i32
  }
  func.func @transform_6(%arg0: i32, %arg1: memref<2xi32, #tpu.memory_space<smem>>) -> (i32, i32) {
    %c0_i32 = arith.constant 0 : i32
    %c0_i32_0 = arith.constant 0 : i32
    return %arg0, %c0_i32 : i32, i32
  }
  func.func @transform_7(%arg0: i32, %arg1: memref<2xi32, #tpu.memory_space<smem>>) -> (i32, i32) {
    %c0_i32 = arith.constant 0 : i32
    %c0_i32_0 = arith.constant 0 : i32
    return %arg0, %c0_i32 : i32, i32
  }
}

</mosaic_0001>

<bundles_post_ra>
// kernel: tpu_custom_call.1
= control target key start
LH: loop header
LB: loop body
LE: loop exit
PB: predicated region body
PF: predicated region fallthrough
CT: control target
= control target key end

     0   :  { %s857_s0 = inlined_call_operand.vmem [shape: s32[2], index: 0, kind: input, shape index: {}]   ;;  %s858_s1 = inlined_call_operand.vmem [shape: f32[32,16], index: 1, kind: input, shape index: {}]   ;;  %s859_s2 = inlined_call_operand.vmem [shape: f32[8,256], index: 2, kind: input, shape index: {}]   ;;  %s860_s3 = inlined_call_operand.vmem [shape: f32[48,32], index: 3, kind: input, shape index: {}]   ;;  %s861_s4 = inlined_call_operand.vmem [shape: f32[48,1], index: 4, kind: input, shape index: {}]   ;;  %s862_s5 = inlined_call_operand.vmem [shape: f32[18,48], index: 5, kind: input, shape index: {}]   ;;  %s863_s6 = inlined_call_operand.vmem [shape: f32[18,1], index: 6, kind: input, shape index: {}]   ;;  %s864_s7 = inlined_call_operand.hbm [shape: f32[8,256], index: 7, kind: output, shape index: {0}]   ;;  %s865_s8 = inlined_call_operand.hbm [shape: f32[4,8], index: 8, kind: output, shape index: {1}]  }
   0x1   :  { %s14_s29 = sshll.u32 %s857_s0, 4  ;;  %s15_s29 = int_to_ptr.vmem [resolvable:$true] %s14_s29 }
   0x2   :  { %s620_s30 = scalar_lea.vmem %s15_s29, 16  ;;  %p625_p1 = scmp.lt.s32.totalorder %s15_s29, %s15_s29 }
   0x3   :  { %p621_p0 = scmp.ne.s32.totalorder %s15_s29, %s620_s30  ;;  %p626_p2 = scmp.lt.s32.totalorder %s620_s30, %s620_s30 }
   0x5   :  { %p627_p3 = por %p626_p2, %p625_p1 }
   0x7   :  { %p628_p4 = pnand %p627_p3, %p621_p0 }
   0x9   :  { %631 = shalt.err (!%p628_p4)  }
   0xa   :  { %s682_s9 = smov [#allocation3]  }
   0xb   :  { %17 = dma.vmem_to_smem %s15_s29, 16, %s682_s9, [#allocation2] }
   0xc   :  { %676 = dma.done.wait [#allocation2], 16 }
   0xd   :  { %677 = vsyncadd [#allocation2], 4294967280 }
   0xe   :  { %19 = sfence }
   0xf   :  { %20 = vsyncpa [#allocation5], 0  ;;  %v40_v0 = vld [vmem:[%s858_s1] sm:$0xff]  ;;  %v41_v1 = vld [vmem:[%s858_s1 + $0x8] sm:$0xff]  ;;  %vm80_vm0 = vcmask 261120   ;;  %v683_v6 = vmov 0  }
  0x10   :  { %v42_v2 = vld [vmem:[%s858_s1 + $0x10] sm:$0xff]  ;;  %v578_v3 = vpack.c.bf16 %v41_v1, %v40_v0  ;;  %v43_v4 = vld [vmem:[%s858_s1 + $0x18] sm:$0xff]  ;;  %v34_v5 = vld [vmem:[%s860_s3] sm:$0xff]  ;;  %604 = vset.pattern.permute.xlu0 %v683_v6  ;;  %605 = vset.pattern.permute.xlu1 %v683_v6 }
  0x11   :  { %v582_v7 = vpack.c.bf16 %v43_v4, %v42_v2  ;;  %548 = vmatprep.mubr.msk.f32.mxu0 %vm80_vm0, %v34_v5  ;;  %v44_v8 = vld [vmem:[%s861_s4] sm:$0xff]  ;;  %v46_v9 = vld [vmem:[%s861_s4 + $0x10] sm:$0xff]  ;;  %v45_v10 = vld [vmem:[%s861_s4 + $0x8] sm:$0xff] }
  0x12   :  { %579 = vmatprep.subr.bf16.mxu0 %v578_v3  ;;  %52 = vperm.xlu0 %604, %v44_v8  }
  0x13   :  { %581 = vmatpush3.bf16.msra.mxu0 %v578_v3  ;;  %62 = vperm.xlu1 %605, %v46_v9  }
  0x14   :  { %583 = vmatprep.subr.bf16.mxu0 %v582_v7 }
  0x15   :  { %21 = vsyncpa [#allocation7], 0  ;;  %v47_v11 = vld [vmem:[%s861_s4 + $0x18] sm:$0xff]  ;;  %v35_v12 = vld [vmem:[%s860_s3 + $0x8] sm:$0xff]  ;;  %v684_v20 = vmov 0.0|0.0   ;;  %vm685_vm1 = vmmov 0   ;;  %v311_v1 = vlaneseq }
  0x16   :  { %57 = vperm.xlu0 %604, %v45_v10   ;;  %v36_v13 = vld [vmem:[%s860_s3 + $0x10] sm:$0xff]  ;;  %v48_v14 = vld [vmem:[%s861_s4 + $0x20] sm:$0xff]  ;;  %v49_v15 = vld [vmem:[%s861_s4 + $0x28] sm:$0xff]  ;;  %586 = vmatprep.subr.bf16.mxu1 %v684_v20  ;;  %v686_v21 = vmov 0.0   ;;  %vm221_vm2 = vcmask 392192   ;;  %s314_s1 = sld [smem:[#allocation3]] }
  0x17   :  { %585 = vmatpush3.bf16.msra.mxu0 %v582_v7  ;;  %67 = vperm.xlu1 %605, %v47_v11   ;;  %v37_v16 = vld [vmem:[%s860_s3 + $0x18] sm:$0xff]  ;;  %v38_v17 = vld [vmem:[%s860_s3 + $0x20] sm:$0xff]  ;;  %v205_v18 = vld [vmem:[%s863_s6 + $0x10] sm:$0x3]  ;;  %v312_v2 = vand.u32 127, %v311_v1  ;;  %s520_s23 = sld [smem:[#allocation3 + $0x1]] }
  0x18   :  { %v39_v19 = vld [vmem:[%s860_s3 + $0x28] sm:$0xff]  ;;  %569 = vmatprep.mubr.msk.f32.mxu1 %vm685_vm1, %v686_v21  ;;  %v200_v49 = vld [vmem:[%s862_s5] sm:$0xff]  ;;  %v202_v51 = vld [vmem:[%s862_s5 + $0x10] sm:$0x3]  ;;  %vm326_vm5 = vcmask 57344   ;;  %s688_s28 = smov 8  }
  0x19   :  { %v201_v50 = vld [vmem:[%s862_s5 + $0x8] sm:$0xff]  ;;  %s687_s5 = smov 120   ;;  %vm332_vm6 = vcmask 58369   ;;  %vm434_vm7 = vcmask 1040384   ;;  %vm436_vm8 = vcmask 1041408   ;;  %vm438_vm9 = vcmask 1042432  }
  0x1a   :  { %549 = vmatmul.mubr.msk.f32.vlgmr.msra.gmra.mrb[0].mxu0 %vm80_vm0, %v35_v12  ;;  %72 = vperm.xlu0 %604, %v48_v14   ;;  %v204_v14 = vld [vmem:[%s863_s6 + $0x8] sm:$0xff]  ;;  %vm440_vm10 = vcmask 60416   ;;  %vm343_vm11 = vcmask 64512   ;;  %vm414_vm12 = vcmask 1043456  }
  0x1b   :  { %551 = vmatprep.mubr.msk.f32.mxu0 %vm80_vm0, %v36_v13  ;;  %77 = vperm.xlu1 %605, %v49_v15   ;;  %v203_v15 = vld [vmem:[%s863_s6] sm:$0xff]  ;;  %s689_s6 = smov [#allocation6]  }
  0x1c   :  { %v315_v3 = vstv %s314_s1  ;;  %s498_s29 = sshll.u32 %s689_s6, 4  ;;  %s499_s29 = int_to_ptr.vmem [resolvable:$true] %s498_s29 }
  0x1d   :  { %vm316_vm3 = vcmp.lt.s32.totalorder %v312_v2, %v315_v3  ;;  %v357_v7 = vstv %s520_s23  ;;  %s632_s30 = scalar_lea.vmem %s499_s29, 64  ;;  %p637_p6 = scmp.lt.s32.totalorder %s499_s29, %s499_s29 }
  0x1e   :  { %552 = vmatmul.mubr.msk.f32.gmra.mrb[2].mxu0 %vm80_vm0, %v37_v16  ;;  %218 = vperm.xlu0 %604, %v205_v18   ;;  %vm358_vm4 = vcmp.lt.s32.totalorder %v312_v2, %v357_v7  ;;  %v339_v18 = vshrl.u32 %v311_v1, 7  ;;  %p633_p5 = scmp.ne.s32.totalorder %s499_s29, %s632_s30  ;;  %p638_p7 = scmp.lt.s32.totalorder %s632_s30, %s632_s30 }
  0x1f   :  { %554 = vmatprep.mubr.msk.f32.mxu0 %vm80_vm0, %v38_v17 }
  0x20   :  { %p639_p8 = por %p638_p7, %p637_p6 }
  0x22   :  { %555 = vmatmul.mubr.msk.f32.gmra.mrb[4].mxu0 %vm80_vm0, %v39_v19  ;;  %v340_v19 = vsub.s32 0, %v339_v18  ;;  %p640_p9 = pnand %p639_p8, %p633_p5 }
  0x91   :  { %v53_v22 = vpop.permute.xlu0 %52 }
  0x92   :  { %v63_v23 = vpop.permute.xlu1 %62 }
  0x95   :  { %v58_v24 = vpop.permute.xlu0 %57 }
  0x96   :  { %v68_v28 = vpop.permute.xlu1 %67 }
  0x99   :  { %v73_v41 = vpop.permute.xlu0 %72 }
  0x9a   :  { %v78_v38 = vpop.permute.xlu1 %77 }
  0x9d   :  { %v219_v56 = vpop.permute.xlu0 %218 }
  0xed   :  { %v550_v25 = vpop.f32.mrb[0].mxu0 }
  0xee   :  { %v171_v26 = vadd.f32 %v550_v25, %v58_v24  ;;  %v165_v27 = vpop.f32.mrb[1].mxu0 }
  0xef   :  { %v166_v29 = vadd.f32 %v165_v27, %v53_v22 }
  0xf0   :  { %v195_v30 = vmax.f32 %v171_v26, 0.0 }
  0xf1   :  { %v194_v31 = vmax.f32 %v166_v29, 0.0  ;;  %v553_v32 = vpop.f32.mrb[2].mxu0 }
  0xf2   :  { %v181_v33 = vadd.f32 %v553_v32, %v68_v28  ;;  %v175_v34 = vpop.f32.mrb[3].mxu0 }
  0xf3   :  { %v176_v35 = vadd.f32 %v175_v34, %v63_v23  ;;  %v587_v36 = vpack.c.bf16 %v195_v30, %v194_v31 }
  0xf4   :  { %v197_v37 = vmax.f32 %v181_v33, 0.0 }
  0xf5   :  { %v196_v39 = vmax.f32 %v176_v35, 0.0  ;;  %v556_v40 = vpop.f32.mrb[4].mxu0  ;;  %588 = vmatpush3.bf16.msra.mxu1 %v587_v36 }
  0xf6   :  { %v191_v42 = vadd.f32 %v556_v40, %v78_v38  ;;  %v185_v43 = vpop.f32.mrb[5].mxu0  ;;  %589 = vmatprep.subr.bf16.mxu1 %v684_v20 }
  0xf7   :  { %v590_v44 = vpack.c.bf16 %v197_v37, %v196_v39  ;;  %v186_v45 = vadd.f32 %v185_v43, %v73_v41 }
  0xf8   :  { %v199_v46 = vmax.f32 %v191_v42, 0.0 }
  0xf9   :  { %v198_v47 = vmax.f32 %v186_v45, 0.0  ;;  %591 = vmatpush3.bf16.msra.mxu1 %v590_v44 }
  0xfa   :  { %592 = vmatprep.subr.bf16.mxu1 %v684_v20 }
  0xfb   :  { %v593_v48 = vpack.c.bf16 %v199_v46, %v198_v47 }
  0xfd   :  { %594 = vmatpush3.bf16.msra.mxu1 %v593_v48 }
 0x100   :  { %570 = vmatmul.mubr.msk.f32.vlgmr.msra.gmra.mrb[0].mxu1 %vm221_vm2, %v200_v49 }
 0x101   :  { %572 = vmatprep.mubr.msk.f32.mxu1 %vm685_vm1, %v686_v21 }
 0x104   :  { %573 = vmatmul.mubr.msk.f32.gmra.mrb[2].mxu1 %vm221_vm2, %v201_v50  ;;  %v349_v50 = vsub.s32 1, %v339_v18 }
 0x105   :  { %575 = vmatprep.mubr.msk.f32.mxu1 %vm685_vm1, %v686_v21 }
 0x108   :  { %576 = vmatmul.mubr.msk.f32.gmra.mrb[4].mxu1 %vm221_vm2, %v202_v51 }
 0x1d3   :  { %v808_v52 = vpop.f32.mrb[0].mxu1 }
 0x1d4   :  { %v571_v53 = vpop.f32.mrb[1].mxu1 }
 0x1d7   :  { %v810_v54 = vpop.f32.mrb[2].mxu1 }
 0x1d8   :  { %v574_v55 = vpop.f32.mrb[3].mxu1 }
 0x1db   :  { %v307_v57 = vpop.f32.mrb[4].mxu1 }
 0x1dc   :  { %v308_v58 = vadd.f32 %v307_v57, %v219_v56  ;;  %v577_v59 = vpop.f32.mrb[5].mxu1 }
 0x1de   :  { %v519_v60 = vmul.f32 -1.442695, %v308_v58 }
 0x1e0   :  { %606 = vpow2.f32 %v519_v60 }
 0x1ea   :  { %v607_v61 = vpop.eup %606 }
 0x1eb   :  { %v320_v62 = vadd.f32 1.0, %v607_v61 }
 0x1ed   :  { %608 = vrcp.f32 %v320_v62 }
 0x1f7   :  { %v609_v63 = vpop.eup %608 }
 0x1f8   :  { %v323_v0 = vmul.f32 1.442695, %v609_v63 }
 0x1fa   :  { %610 = vpow2.f32 %v323_v0 }
 0x204   :  { %v611_v4 = vpop.eup %610 }
 0x205   :  { %360 = vrot.lane.b32.xlu1 %v611_v4, %s687_s5  ;;  %v364_v5 = vrot.slane %v611_v4, 1  ;;  %v325_v6 = vsel %vm316_vm3, %v611_v4, 0.0 }
 0x206   :  { %v333_v26 = vsel %vm332_vm6, %v325_v6, 0.0  ;;  %v327_v27 = vsel %vm326_vm5, %v325_v6, 0.0 }
 0x207   :  { %365 = vrot.lane.b32.xlu0 %v364_v5, %s687_s5 }
 0x277   :  { %v361_v8 = vpop.permute.xlu1 %360 }
 0x278   :  { %v363_v9 = vsel %vm358_vm4, %v361_v8, 0.0 }
 0x279   :  { %v366_v10 = vpop.permute.xlu0 %365  ;;  %v369_v11 = vsel %vm326_vm5, %v363_v9, 0.0 }
 0x27a   :  { %v368_v12 = vsel %vm358_vm4, %v366_v10, 0.0  ;;  %370 = vadd.xlane.f32.xlu1 %v369_v11 }
 0x27b   :  { %v374_v13 = vsel %vm326_vm5, %v368_v12, 0.0 }
 0x27c   :  { %375 = vadd.xlane.f32.xlu0 %v374_v13 }
 0x28b   :  { %213 = vperm.xlu1 %605, %v204_v14  }
 0x292   :  { %208 = vperm.xlu0 %604, %v203_v15  }
 0x307   :  { %v371_v16 = vpop.xlane.xlu1 %370 }
 0x308   :  { %612 = vrcp.f32 %v371_v16 }
 0x309   :  { %v376_v17 = vpop.xlane.xlu0 %375 }
 0x30a   :  { %614 = vrcp.f32 %v376_v17 }
 0x30b   :  { %v214_v28 = vpop.permute.xlu1 %213 }
 0x30c   :  { %v303_v32 = vadd.f32 %v810_v54, %v214_v28 }
 0x311   :  { %v209_v29 = vpop.permute.xlu0 %208 }
 0x312   :  { %v613_v20 = vpop.eup %612  ;;  %v298_v30 = vadd.f32 %v808_v52, %v209_v29 }
 0x313   :  { %v373_v21 = vmul.f32 %v613_v20, %v363_v9 }
 0x314   :  { %v615_v22 = vpop.eup %614 }
 0x315   :  { %v382_v23 = vrot.slane %v373_v21, %v340_v19  ;;  %v378_v24 = vmul.f32 %v615_v22, %v368_v12  ;;  %v429_v42 = vrot.slane %v373_v21, 6 }
 0x317   :  { %384 = vrot.lane.b32.xlu1 %v382_v23, %s688_s28  ;;  %v398_v25 = vrot.slane %v378_v24, %v340_v19  ;;  %v432_v44 = vrot.slane %v378_v24, 5 }
 0x319   :  { %400 = vrot.lane.b32.xlu0 %v398_v25, %s688_s28 }
 0x338   :  { %334 = vadd.xlane.f32.xlu0 %v333_v26 }
 0x33b   :  { %328 = vadd.xlane.f32.xlu1 %v327_v27 }
 0x389   :  { %v385_v31 = vpop.permute.xlu1 %384 }
 0x38a   :  { %v387_v33 = vmul.f32 %v385_v31, %v298_v30 }
 0x38b   :  { %v401_v34 = vpop.permute.xlu0 %400 }
 0x38c   :  { %v403_v35 = vmul.f32 %v401_v34, %v303_v32  ;;  %389 = vrot.lane.b32.xlu0 %v387_v33, %s687_s5 }
 0x38e   :  { %405 = vrot.lane.b32.xlu1 %v403_v35, %s687_s5 }
 0x3c5   :  { %v335_v36 = vpop.xlane.xlu0 %334 }
 0x3c6   :  { %616 = vrcp.f32 %v335_v36 }
 0x3c8   :  { %v329_v37 = vpop.xlane.xlu1 %328 }
 0x3c9   :  { %618 = vrcp.f32 %v329_v37 }
 0x3d0   :  { %v617_v38 = vpop.eup %616 }
 0x3d1   :  { %v337_v41 = vmul.f32 %v617_v38, %v325_v6 }
 0x3d3   :  { %v619_v39 = vpop.eup %618  ;;  %v350_v51 = vrot.slane %v337_v41, %v349_v50 }
 0x3d4   :  { %v331_v40 = vmul.f32 %v619_v39, %v325_v6 }
 0x3d5   :  { %v351_v54 = vmul.f32 %v350_v51, %v303_v32 }
 0x3d6   :  { %v341_v43 = vrot.slane %v331_v40, %v340_v19  ;;  %v435_v45 = vsel %vm434_vm7, %v331_v40, %v337_v41 }
 0x3d7   :  { %v437_v46 = vsel %vm436_vm8, %v435_v45, %v429_v42  ;;  %v352_v57 = vsel %vm343_vm11, %v351_v54, 0.0 }
 0x3d8   :  { %v342_v47 = vmul.f32 %v341_v43, %v298_v30  ;;  %v439_v48 = vsel %vm438_vm9, %v437_v46, %v432_v44 }
 0x3d9   :  { %441 = vst.msk [vmem:[#allocation6] sm:$0xf] %vm440_vm10, %v439_v48 }
 0x3da   :  { %v344_v49 = vsel %vm343_vm11, %v342_v47, 0.0 }
 0x3db   :  { %345 = vadd.xlane.f32.xlu0 %v344_v49 }
 0x3fe   :  { %v390_v52 = vpop.permute.xlu0 %389 }
 0x3ff   :  { %v392_v53 = vsel %vm343_vm11, %v390_v52, 0.0 }
 0x400   :  { %393 = vadd.xlane.f32.xlu1 %v392_v53  ;;  %v406_v55 = vpop.permute.xlu1 %405 }
 0x401   :  { %v408_v56 = vsel %vm343_vm11, %v406_v55, 0.0 }
 0x402   :  { %409 = vadd.xlane.f32.xlu0 %v408_v56 }
 0x404   :  { %353 = vadd.xlane.f32.xlu1 %v352_v57 }
 0x468   :  { %v346_v58 = vpop.xlane.xlu0 %345 }
 0x469   :  { %v417_v59 = vrot.slane %v346_v58, 4 }
 0x48d   :  { %v394_v60 = vpop.xlane.xlu1 %393 }
 0x48e   :  { %v412_v61 = vrot.slane %v394_v60, 4  ;;  %v419_v62 = vsel %vm414_vm12, %v417_v59, %v394_v60 }
 0x48f   :  { %v410_v63 = vpop.xlane.xlu0 %409  ;;  %453 = vperm.xlu1 %605, %v419_v62  }
 0x490   :  { %v421_v0 = vrot.slane %v410_v63, 4  ;;  %v415_v1 = vsel %vm414_vm12, %v346_v58, %v412_v61 }
 0x491   :  { %446 = vperm.xlu0 %604, %v415_v1   ;;  %v354_v2 = vpop.xlane.xlu1 %353 }
 0x492   :  { %v425_v3 = vrot.slane %v354_v2, 4  ;;  %v423_v4 = vsel %vm414_vm12, %v354_v2, %v421_v0 }
 0x493   :  { %464 = vperm.xlu1 %605, %v423_v4  }
 0x494   :  { %v427_v5 = vsel %vm414_vm12, %v425_v3, %v410_v63 }
 0x495   :  { %471 = vperm.xlu0 %604, %v427_v5  }
 0x496   :  { %643 = shalt.err (!%p640_p9)
}
 0x497   :  { %s644_s11 = scalar_lea.hbm %s865_s8, 64 }
 0x498   :  { %p645_p10 = scmp.ne.s32.totalorder %s865_s8, %s644_s11  ;;  %p648_p11 = scmp.lt.u32.totalorder %s644_s11, %s865_s8 }
 0x49a   :  { %p650_p12 = pnand %p648_p11, %p645_p10 }
 0x49c   :  { %653 = shalt.err (!%p650_p12)
}
 0x49d   :  { %501 = dma.vmem_to_hbm [thread:$0]  %s499_s29, 64, %s865_s8, [#allocation7]   ;;  %v442_v6 = vld [vmem:[%s859_s2] sm:$0xff]  ;;  %v443_v7 = vld [vmem:[%s859_s2 + $0x8] sm:$0xff] }
 0x49e   :  { %s690_s8 = smov [#allocation4]  }
 0x49f   :  { %s488_s19 = sshll.u32 %s690_s8, 4  ;;  %s489_s19 = int_to_ptr.vmem [resolvable:$true] %s488_s19 }
 0x4a0   :  { %s654_s2 = scalar_lea.vmem %s489_s19, 256  ;;  %p659_p0 = scmp.lt.s32.totalorder %s489_s19, %s489_s19 }
 0x4a1   :  { %p655_p13 = scmp.ne.s32.totalorder %s489_s19, %s654_s2  ;;  %p660_p1 = scmp.lt.s32.totalorder %s654_s2, %s654_s2 }
 0x4a3   :  { %p661_p2 = por %p660_p1, %p659_p0 }
 0x4a5   :  { %p662_p3 = pnand %p661_p2, %p655_p13 }
 0x50e   :  { %v454_v11 = vpop.permute.xlu1 %453 }
 0x510   :  { %v447_v8 = vpop.permute.xlu0 %446 }
 0x511   :  { %v449_v9 = vmul.f32 %v447_v8, %v442_v6  ;;  %v450_v10 = vmul.f32 %v447_v8, %v443_v7 }
 0x512   :  { %v465_v18 = vpop.permute.xlu1 %464 }
 0x513   :  { %v456_v12 = vadd.f32 %v454_v11, %v449_v9  ;;  %v457_v13 = vadd.f32 %v454_v11, %v450_v10 }
 0x514   :  { %v472_v21 = vpop.permute.xlu0 %471 }
 0x515   :  { %v458_v14 = vmul.f32 0.2, %v456_v12  ;;  %v459_v15 = vmul.f32 0.2, %v457_v13 }
 0x517   :  { %v460_v16 = vmax.f32 %v456_v12, %v458_v14  ;;  %v461_v17 = vmax.f32 %v457_v13, %v459_v15 }
 0x519   :  { %v467_v19 = vmul.f32 %v465_v18, %v460_v16  ;;  %v468_v20 = vmul.f32 %v465_v18, %v461_v17 }
 0x51b   :  { %v474_v22 = vadd.f32 %v472_v21, %v467_v19  ;;  %v475_v23 = vadd.f32 %v472_v21, %v468_v20 }
 0x51d   :  { %v476_v24 = vmul.f32 0.2, %v474_v22  ;;  %v477_v25 = vmul.f32 0.2, %v475_v23 }
 0x51f   :  { %v478_v26 = vmax.f32 %v474_v22, %v476_v24  ;;  %v479_v27 = vmax.f32 %v475_v23, %v477_v25 }
 0x521   :  { %480 = vst [vmem:[#allocation4] sm:$0xff] %v478_v26  ;;  %481 = vst [vmem:[#allocation4 + $0x8] sm:$0xff] %v479_v27 }
 0x522   :  { %665 = shalt.err (!%p662_p3)
}
 0x523   :  { %s666_s22 = scalar_lea.hbm %s864_s7, 256 }
 0x524   :  { %p667_p4 = scmp.ne.s32.totalorder %s864_s7, %s666_s22  ;;  %p670_p5 = scmp.lt.u32.totalorder %s666_s22, %s864_s7 }
 0x526   :  { %p672_p6 = pnand %p670_p5, %p667_p4 }
 0x528   :  { %675 = shalt.err (!%p672_p6)
}
 0x529   :  { %491 = dma.vmem_to_hbm [thread:$0]  %s489_s19, 256, %s864_s7, [#allocation5]  }
 0x52a   :  { %678 = dma.done.wait [#allocation5], 256  }
 0x52b   :  { %679 = vsyncadd [#allocation5], 4294967040 }
 0x52c   :  { %680 = dma.done.wait [#allocation7], 64  }
 0x52d   :  { %681 = vsyncadd [#allocation7], 4294967232 }
 0x52e   :  { %508 = vsyncpa [#allocation5], 1 }
 0x52f   :  { %509 = vsyncpa [#allocation7], 1 }

</bundles_post_ra>
